<compile_context>
chip_gen: v6e
topology: v6e:2x2x1
jax: 0.10.0
libtpu: 0.0.40
codegen_flags: <defaults>
</compile_context>

<pallas_src>
import jax
import jax.numpy as jnp
from jax.experimental import pallas as pl
from jax.experimental.pallas import tpu as pltpu


def _relu_kernel(x_ref, o_ref):
    # Single elementwise max with a scalar 0 on the VPU.
    o_ref[...] = jnp.maximum(x_ref[...], 0.0)


def relu_pallas(x: jax.Array) -> jax.Array:
    """ReLU over an NCHW tensor, computed in a single Pallas TPU kernel call."""
    orig_shape = x.shape
    total = x.size

    # Lane-dense 2-D slab: second-to-last dim a multiple of 8 (sublanes),
    # last dim as wide as possible (lane axis).  Contiguous reshape == bitcast.
    rows = 8
    assert total % rows == 0, "unexpected element count for lane-dense reshape"
    x2d = x.reshape(rows, total // rows)  # (8, 10584) for [1,1728,7,7]

    out2d = pl.pallas_call(
        _relu_kernel,
        out_shape=jax.ShapeDtypeStruct(x2d.shape, x2d.dtype),
        # No grid: whole array lives in VMEM for the single kernel invocation.
        in_specs=[pl.BlockSpec(memory_space=pltpu.MemorySpace.VMEM)],
        out_specs=pl.BlockSpec(memory_space=pltpu.MemorySpace.VMEM),
        # In-place update (mirrors ReLU(inplace=True)); avoids a second
        # HBM output allocation around the custom call.
        input_output_aliases={0: 0},
    )(x2d)

    return out2d.reshape(orig_shape)


if __name__ == "__main__":
    key = jax.random.PRNGKey(0)
    # Shape matches the module's forward: x665 = randn([1, 1728, 7, 7])
    x = jax.random.normal(key, (1, 1728, 7, 7), dtype=jnp.float32)

    # Reference computed before the (aliased) kernel call.
    y_ref = jnp.maximum(x, 0.0)

    y = relu_pallas(x)
    jax.block_until_ready(y)

    assert y.shape == x.shape and y.dtype == x.dtype
    assert bool(jnp.all(y == y_ref))

    print("KERNEL_OK")
</pallas_src>

<mosaic_0001>
module attributes {stable_mosaic.version = 11 : i64} {
  func.func @_relu_kernel(%arg0: memref<8x10584xf32, #tpu.memory_space<vmem>>, %arg1: memref<8x10584xf32, #tpu.memory_space<vmem>>) attributes {dimension_semantics = [], scalar_prefetch = 0 : i64, scratch_operands = 0 : i64, tpu.core_type = #tpu.core_type<tc>} {
    %c0 = arith.constant 0 : index
    %c0_0 = arith.constant 0 : index
    %0 = vector.load %arg0[%c0, %c0_0] : memref<8x10584xf32, #tpu.memory_space<vmem>>, vector<8x10584xf32>
    %cst = arith.constant 0.000000e+00 : f32
    %1 = vector.broadcast %cst : f32 to vector<8x10584xf32>
    %2 = arith.maximumf %0, %1 : vector<8x10584xf32>
    %c0_1 = arith.constant 0 : index
    %c0_2 = arith.constant 0 : index
    %3 = vector.load %arg1[%c0_1, %c0_2] : memref<8x10584xf32, #tpu.memory_space<vmem>>, vector<8x10584xf32>
    tpu.vector_store %arg1[%c0_1, %c0_2], %2 {strides = array<i32>} : memref<8x10584xf32, #tpu.memory_space<vmem>>, vector<8x10584xf32>,
    return
  }
}

</mosaic_0001>

<bundles_post_ra>
// kernel: tpu_custom_call.1
= control target key start
LH: loop header
LB: loop body
LE: loop exit
PB: predicated region body
PF: predicated region fallthrough
CT: control target
= control target key end

     0   :  { %6 = vsyncpa [#allocation3], 0  ;;  %s353_s0 = inlined_call_operand.hbm [shape: f32[8,10584], index: 0, kind: input, shape index: {}, may-alias: {0,1}]   ;;  %s354_s1 = inlined_call_operand.hbm [shape: f32[8,10584], index: 1, kind: output, shape index: {}, may-alias: {0,1}]  }
   0x1   :  { %7 = vsyncpa [#allocation4], 0  ;;  %s332_s6 = smov [#allocation2]  }
   0x2   :  { %s14_s7 = sshll.u32 %s332_s6, 4  ;;  %s15_s7 = int_to_ptr.vmem [resolvable:$true] %s14_s7 }
   0x3   :  { %s296_s8 = scalar_lea.vmem %s15_s7, 10624  ;;  %p301_p1 = scmp.lt.s32.totalorder %s15_s7, %s15_s7 }
   0x4   :  { %p297_p0 = scmp.ne.s32.totalorder %s15_s7, %s296_s8  ;;  %p302_p2 = scmp.lt.s32.totalorder %s296_s8, %s296_s8 }
   0x6   :  { %p303_p3 = por %p302_p2, %p301_p1 }
   0x8   :  { %p304_p4 = pnand %p303_p3, %p297_p0 }
   0xa   :  { %307 = shalt.err (!%p304_p4)
}
   0xb   :  { %17 = dma.hbm_to_vmem [thread:$0]  %s353_s0, 10624, %s15_s7, [#allocation3]  }
   0xc   :  { %328 = dma.done.wait [#allocation3], 10624  }
   0xd   :  { %329 = vsyncadd [#allocation3], 4294956672  ;;  %v21_v0 = vld [vmem:[#allocation2] sm:$0xff]  ;;  %v22_v1 = vld [vmem:[#allocation2 + $0x8] sm:$0xff]  ;;  %s333_s11 = smov [#allocation5]   ;;  %vm269_vm0 = vcmask 719872  }
   0xe   :  { %v23_v2 = vld [vmem:[#allocation2 + $0x10] sm:$0xff]  ;;  %s347_s12 = sshll.u32 %s333_s11, 4  ;;  %v104_v3 = vmax.f32 %v21_v0, 0.0  ;;  %v105_v4 = vmax.f32 %v22_v1, 0.0  ;;  %v24_v6 = vld [vmem:[#allocation2 + $0x18] sm:$0xff]  ;;  %v25_v7 = vld [vmem:[#allocation2 + $0x20] sm:$0xff]  ;;  %s278_s12 = int_to_ptr.vmem [resolvable:$true] %s347_s12 }
   0xf   :  { %v106_v5 = vmax.f32 %v23_v2, 0.0  ;;  %v26_v8 = vld [vmem:[#allocation2 + $0x28] sm:$0xff]  ;;  %v107_v9 = vmax.f32 %v24_v6, 0.0  ;;  %v108_v10 = vmax.f32 %v25_v7, 0.0  ;;  %v27_v12 = vld [vmem:[#allocation2 + $0x30] sm:$0xff]  ;;  %v28_v13 = vld [vmem:[#allocation2 + $0x38] sm:$0xff]  ;;  %p313_p6 = scmp.lt.s32.totalorder %s278_s12, %s278_s12 }
  0x10   :  { %v109_v11 = vmax.f32 %v26_v8, 0.0  ;;  %v29_v14 = vld [vmem:[#allocation2 + $0x40] sm:$0xff]  ;;  %187 = vst [vmem:[#allocation5] sm:$0xff] %v104_v3  ;;  %188 = vst [vmem:[#allocation5 + $0x8] sm:$0xff] %v105_v4  ;;  %v110_v15 = vmax.f32 %v27_v12, 0.0  ;;  %v111_v16 = vmax.f32 %v28_v13, 0.0 }
  0x11   :  { %189 = vst [vmem:[#allocation5 + $0x10] sm:$0xff] %v106_v5  ;;  %v112_v17 = vmax.f32 %v29_v14, 0.0  ;;  %v30_v18 = vld [vmem:[#allocation2 + $0x48] sm:$0xff]  ;;  %v31_v19 = vld [vmem:[#allocation2 + $0x50] sm:$0xff]  ;;  %v32_v20 = vld [vmem:[#allocation2 + $0x58] sm:$0xff]  ;;  %s308_s0 = scalar_lea.vmem %s278_s12, 10624 }
  0x12   :  { %190 = vst [vmem:[#allocation5 + $0x18] sm:$0xff] %v107_v9  ;;  %191 = vst [vmem:[#allocation5 + $0x20] sm:$0xff] %v108_v10  ;;  %v113_v21 = vmax.f32 %v30_v18, 0.0  ;;  %v114_v22 = vmax.f32 %v31_v19, 0.0  ;;  %v115_v23 = vmax.f32 %v32_v20, 0.0  ;;  %v33_v24 = vld [vmem:[#allocation2 + $0x60] sm:$0xff]  ;;  %p309_p5 = scmp.ne.s32.totalorder %s278_s12, %s308_s0  ;;  %p314_p7 = scmp.lt.s32.totalorder %s308_s0, %s308_s0 }
  0x13   :  { %192 = vst [vmem:[#allocation5 + $0x28] sm:$0xff] %v109_v11  ;;  %v34_v25 = vld [vmem:[#allocation2 + $0x68] sm:$0xff]  ;;  %v35_v26 = vld [vmem:[#allocation2 + $0x70] sm:$0xff]  ;;  %193 = vst [vmem:[#allocation5 + $0x30] sm:$0xff] %v110_v15  ;;  %v116_v27 = vmax.f32 %v33_v24, 0.0 }
  0x14   :  { %194 = vst [vmem:[#allocation5 + $0x38] sm:$0xff] %v111_v16  ;;  %195 = vst [vmem:[#allocation5 + $0x40] sm:$0xff] %v112_v17  ;;  %v117_v28 = vmax.f32 %v34_v25, 0.0  ;;  %v118_v29 = vmax.f32 %v35_v26, 0.0  ;;  %v36_v30 = vld [vmem:[#allocation2 + $0x78] sm:$0xff]  ;;  %v37_v31 = vld [vmem:[#allocation2 + $0x80] sm:$0xff]  ;;  %p315_p8 = por %p314_p7, %p313_p6 }
  0x15   :  { %v38_v32 = vld [vmem:[#allocation2 + $0x88] sm:$0xff]  ;;  %196 = vst [vmem:[#allocation5 + $0x48] sm:$0xff] %v113_v21  ;;  %197 = vst [vmem:[#allocation5 + $0x50] sm:$0xff] %v114_v22  ;;  %v119_v33 = vmax.f32 %v36_v30, 0.0  ;;  %v120_v34 = vmax.f32 %v37_v31, 0.0  ;;  %v39_v36 = vld [vmem:[#allocation2 + $0x90] sm:$0xff] }
  0x16   :  { %198 = vst [vmem:[#allocation5 + $0x58] sm:$0xff] %v115_v23  ;;  %v121_v35 = vmax.f32 %v38_v32, 0.0  ;;  %v40_v37 = vld [vmem:[#allocation2 + $0x98] sm:$0xff]  ;;  %v41_v38 = vld [vmem:[#allocation2 + $0xa0] sm:$0xff]  ;;  %199 = vst [vmem:[#allocation5 + $0x60] sm:$0xff] %v116_v27  ;;  %v122_v39 = vmax.f32 %v39_v36, 0.0  ;;  %p316_p9 = pnand %p315_p8, %p309_p5 }
  0x17   :  { %200 = vst [vmem:[#allocation5 + $0x68] sm:$0xff] %v117_v28  ;;  %201 = vst [vmem:[#allocation5 + $0x70] sm:$0xff] %v118_v29  ;;  %v123_v40 = vmax.f32 %v40_v37, 0.0  ;;  %v124_v41 = vmax.f32 %v41_v38, 0.0  ;;  %v42_v42 = vld [vmem:[#allocation2 + $0xa8] sm:$0xff]  ;;  %v43_v43 = vld [vmem:[#allocation2 + $0xb0] sm:$0xff] }
  0x18   :  { %v44_v44 = vld [vmem:[#allocation2 + $0xb8] sm:$0xff]  ;;  %202 = vst [vmem:[#allocation5 + $0x78] sm:$0xff] %v119_v33  ;;  %203 = vst [vmem:[#allocation5 + $0x80] sm:$0xff] %v120_v34  ;;  %v125_v45 = vmax.f32 %v42_v42, 0.0  ;;  %v126_v46 = vmax.f32 %v43_v43, 0.0  ;;  %v45_v48 = vld [vmem:[#allocation2 + $0xc0] sm:$0xff] }
  0x19   :  { %204 = vst [vmem:[#allocation5 + $0x88] sm:$0xff] %v121_v35  ;;  %v127_v47 = vmax.f32 %v44_v44, 0.0  ;;  %v46_v49 = vld [vmem:[#allocation2 + $0xc8] sm:$0xff]  ;;  %v47_v50 = vld [vmem:[#allocation2 + $0xd0] sm:$0xff]  ;;  %205 = vst [vmem:[#allocation5 + $0x90] sm:$0xff] %v122_v39  ;;  %v128_v51 = vmax.f32 %v45_v48, 0.0 }
  0x1a   :  { %206 = vst [vmem:[#allocation5 + $0x98] sm:$0xff] %v123_v40  ;;  %207 = vst [vmem:[#allocation5 + $0xa0] sm:$0xff] %v124_v41  ;;  %v129_v52 = vmax.f32 %v46_v49, 0.0  ;;  %v130_v53 = vmax.f32 %v47_v50, 0.0  ;;  %v48_v54 = vld [vmem:[#allocation2 + $0xd8] sm:$0xff]  ;;  %v49_v55 = vld [vmem:[#allocation2 + $0xe0] sm:$0xff] }
  0x1b   :  { %v50_v56 = vld [vmem:[#allocation2 + $0xe8] sm:$0xff]  ;;  %208 = vst [vmem:[#allocation5 + $0xa8] sm:$0xff] %v125_v45  ;;  %209 = vst [vmem:[#allocation5 + $0xb0] sm:$0xff] %v126_v46  ;;  %v131_v57 = vmax.f32 %v48_v54, 0.0  ;;  %v132_v58 = vmax.f32 %v49_v55, 0.0  ;;  %v51_v60 = vld [vmem:[#allocation2 + $0xf0] sm:$0xff] }
  0x1c   :  { %210 = vst [vmem:[#allocation5 + $0xb8] sm:$0xff] %v127_v47  ;;  %v133_v59 = vmax.f32 %v50_v56, 0.0  ;;  %v52_v61 = vld [vmem:[#allocation2 + $0xf8] sm:$0xff]  ;;  %v53_v62 = vld [vmem:[#allocation2 + $0x100] sm:$0xff]  ;;  %211 = vst [vmem:[#allocation5 + $0xc0] sm:$0xff] %v128_v51  ;;  %v134_v63 = vmax.f32 %v51_v60, 0.0 }
  0x1d   :  { %212 = vst [vmem:[#allocation5 + $0xc8] sm:$0xff] %v129_v52  ;;  %213 = vst [vmem:[#allocation5 + $0xd0] sm:$0xff] %v130_v53  ;;  %v135_v0 = vmax.f32 %v52_v61, 0.0  ;;  %v136_v1 = vmax.f32 %v53_v62, 0.0  ;;  %v54_v2 = vld [vmem:[#allocation2 + $0x108] sm:$0xff]  ;;  %v55_v3 = vld [vmem:[#allocation2 + $0x110] sm:$0xff] }
  0x1e   :  { %v56_v4 = vld [vmem:[#allocation2 + $0x118] sm:$0xff]  ;;  %214 = vst [vmem:[#allocation5 + $0xd8] sm:$0xff] %v131_v57  ;;  %215 = vst [vmem:[#allocation5 + $0xe0] sm:$0xff] %v132_v58  ;;  %v137_v5 = vmax.f32 %v54_v2, 0.0  ;;  %v138_v6 = vmax.f32 %v55_v3, 0.0  ;;  %v57_v8 = vld [vmem:[#allocation2 + $0x120] sm:$0xff] }
  0x1f   :  { %216 = vst [vmem:[#allocation5 + $0xe8] sm:$0xff] %v133_v59  ;;  %v139_v7 = vmax.f32 %v56_v4, 0.0  ;;  %v58_v9 = vld [vmem:[#allocation2 + $0x128] sm:$0xff]  ;;  %v59_v10 = vld [vmem:[#allocation2 + $0x130] sm:$0xff]  ;;  %217 = vst [vmem:[#allocation5 + $0xf0] sm:$0xff] %v134_v63  ;;  %v140_v11 = vmax.f32 %v57_v8, 0.0 }
  0x20   :  { %218 = vst [vmem:[#allocation5 + $0xf8] sm:$0xff] %v135_v0  ;;  %219 = vst [vmem:[#allocation5 + $0x100] sm:$0xff] %v136_v1  ;;  %v141_v12 = vmax.f32 %v58_v9, 0.0  ;;  %v142_v13 = vmax.f32 %v59_v10, 0.0  ;;  %v60_v14 = vld [vmem:[#allocation2 + $0x138] sm:$0xff]  ;;  %v61_v15 = vld [vmem:[#allocation2 + $0x140] sm:$0xff] }
  0x21   :  { %v62_v16 = vld [vmem:[#allocation2 + $0x148] sm:$0xff]  ;;  %220 = vst [vmem:[#allocation5 + $0x108] sm:$0xff] %v137_v5  ;;  %221 = vst [vmem:[#allocation5 + $0x110] sm:$0xff] %v138_v6  ;;  %v143_v17 = vmax.f32 %v60_v14, 0.0  ;;  %v144_v18 = vmax.f32 %v61_v15, 0.0  ;;  %v63_v20 = vld [vmem:[#allocation2 + $0x150] sm:$0xff] }
  0x22   :  { %222 = vst [vmem:[#allocation5 + $0x118] sm:$0xff] %v139_v7  ;;  %v145_v19 = vmax.f32 %v62_v16, 0.0  ;;  %v64_v21 = vld [vmem:[#allocation2 + $0x158] sm:$0xff]  ;;  %v65_v22 = vld [vmem:[#allocation2 + $0x160] sm:$0xff]  ;;  %223 = vst [vmem:[#allocation5 + $0x120] sm:$0xff] %v140_v11  ;;  %v146_v23 = vmax.f32 %v63_v20, 0.0 }
  0x23   :  { %224 = vst [vmem:[#allocation5 + $0x128] sm:$0xff] %v141_v12  ;;  %225 = vst [vmem:[#allocation5 + $0x130] sm:$0xff] %v142_v13  ;;  %v147_v24 = vmax.f32 %v64_v21, 0.0  ;;  %v148_v25 = vmax.f32 %v65_v22, 0.0  ;;  %v66_v26 = vld [vmem:[#allocation2 + $0x168] sm:$0xff]  ;;  %v67_v27 = vld [vmem:[#allocation2 + $0x170] sm:$0xff] }
  0x24   :  { %v68_v28 = vld [vmem:[#allocation2 + $0x178] sm:$0xff]  ;;  %226 = vst [vmem:[#allocation5 + $0x138] sm:$0xff] %v143_v17  ;;  %227 = vst [vmem:[#allocation5 + $0x140] sm:$0xff] %v144_v18  ;;  %v149_v29 = vmax.f32 %v66_v26, 0.0  ;;  %v150_v30 = vmax.f32 %v67_v27, 0.0  ;;  %v69_v32 = vld [vmem:[#allocation2 + $0x180] sm:$0xff] }
  0x25   :  { %228 = vst [vmem:[#allocation5 + $0x148] sm:$0xff] %v145_v19  ;;  %v151_v31 = vmax.f32 %v68_v28, 0.0  ;;  %v70_v33 = vld [vmem:[#allocation2 + $0x188] sm:$0xff]  ;;  %v71_v34 = vld [vmem:[#allocation2 + $0x190] sm:$0xff]  ;;  %229 = vst [vmem:[#allocation5 + $0x150] sm:$0xff] %v146_v23  ;;  %v152_v35 = vmax.f32 %v69_v32, 0.0 }
  0x26   :  { %230 = vst [vmem:[#allocation5 + $0x158] sm:$0xff] %v147_v24  ;;  %231 = vst [vmem:[#allocation5 + $0x160] sm:$0xff] %v148_v25  ;;  %v153_v36 = vmax.f32 %v70_v33, 0.0  ;;  %v154_v37 = vmax.f32 %v71_v34, 0.0  ;;  %v72_v38 = vld [vmem:[#allocation2 + $0x198] sm:$0xff]  ;;  %v73_v39 = vld [vmem:[#allocation2 + $0x1a0] sm:$0xff] }
  0x27   :  { %v74_v40 = vld [vmem:[#allocation2 + $0x1a8] sm:$0xff]  ;;  %232 = vst [vmem:[#allocation5 + $0x168] sm:$0xff] %v149_v29  ;;  %233 = vst [vmem:[#allocation5 + $0x170] sm:$0xff] %v150_v30  ;;  %v155_v41 = vmax.f32 %v72_v38, 0.0  ;;  %v156_v42 = vmax.f32 %v73_v39, 0.0  ;;  %v75_v44 = vld [vmem:[#allocation2 + $0x1b0] sm:$0xff] }
  0x28   :  { %234 = vst [vmem:[#allocation5 + $0x178] sm:$0xff] %v151_v31  ;;  %v157_v43 = vmax.f32 %v74_v40, 0.0  ;;  %v76_v45 = vld [vmem:[#allocation2 + $0x1b8] sm:$0xff]  ;;  %v77_v46 = vld [vmem:[#allocation2 + $0x1c0] sm:$0xff]  ;;  %235 = vst [vmem:[#allocation5 + $0x180] sm:$0xff] %v152_v35  ;;  %v158_v47 = vmax.f32 %v75_v44, 0.0 }
  0x29   :  { %236 = vst [vmem:[#allocation5 + $0x188] sm:$0xff] %v153_v36  ;;  %237 = vst [vmem:[#allocation5 + $0x190] sm:$0xff] %v154_v37  ;;  %v159_v48 = vmax.f32 %v76_v45, 0.0  ;;  %v160_v49 = vmax.f32 %v77_v46, 0.0  ;;  %v78_v50 = vld [vmem:[#allocation2 + $0x1c8] sm:$0xff]  ;;  %v79_v51 = vld [vmem:[#allocation2 + $0x1d0] sm:$0xff] }
  0x2a   :  { %v80_v52 = vld [vmem:[#allocation2 + $0x1d8] sm:$0xff]  ;;  %238 = vst [vmem:[#allocation5 + $0x198] sm:$0xff] %v155_v41  ;;  %239 = vst [vmem:[#allocation5 + $0x1a0] sm:$0xff] %v156_v42  ;;  %v161_v53 = vmax.f32 %v78_v50, 0.0  ;;  %v162_v54 = vmax.f32 %v79_v51, 0.0  ;;  %v81_v56 = vld [vmem:[#allocation2 + $0x1e0] sm:$0xff] }
  0x2b   :  { %240 = vst [vmem:[#allocation5 + $0x1a8] sm:$0xff] %v157_v43  ;;  %v163_v55 = vmax.f32 %v80_v52, 0.0  ;;  %v82_v57 = vld [vmem:[#allocation2 + $0x1e8] sm:$0xff]  ;;  %v83_v58 = vld [vmem:[#allocation2 + $0x1f0] sm:$0xff]  ;;  %241 = vst [vmem:[#allocation5 + $0x1b0] sm:$0xff] %v158_v47  ;;  %v164_v59 = vmax.f32 %v81_v56, 0.0 }
  0x2c   :  { %242 = vst [vmem:[#allocation5 + $0x1b8] sm:$0xff] %v159_v48  ;;  %243 = vst [vmem:[#allocation5 + $0x1c0] sm:$0xff] %v160_v49  ;;  %v165_v60 = vmax.f32 %v82_v57, 0.0  ;;  %v166_v61 = vmax.f32 %v83_v58, 0.0  ;;  %v84_v62 = vld [vmem:[#allocation2 + $0x1f8] sm:$0xff]  ;;  %v85_v63 = vld [vmem:[#allocation2 + $0x200] sm:$0xff] }
  0x2d   :  { %v86_v0 = vld [vmem:[#allocation2 + $0x208] sm:$0xff]  ;;  %244 = vst [vmem:[#allocation5 + $0x1c8] sm:$0xff] %v161_v53  ;;  %245 = vst [vmem:[#allocation5 + $0x1d0] sm:$0xff] %v162_v54  ;;  %v167_v1 = vmax.f32 %v84_v62, 0.0  ;;  %v168_v2 = vmax.f32 %v85_v63, 0.0  ;;  %v87_v4 = vld [vmem:[#allocation2 + $0x210] sm:$0xff] }
  0x2e   :  { %246 = vst [vmem:[#allocation5 + $0x1d8] sm:$0xff] %v163_v55  ;;  %v169_v3 = vmax.f32 %v86_v0, 0.0  ;;  %v88_v5 = vld [vmem:[#allocation2 + $0x218] sm:$0xff]  ;;  %v89_v6 = vld [vmem:[#allocation2 + $0x220] sm:$0xff]  ;;  %247 = vst [vmem:[#allocation5 + $0x1e0] sm:$0xff] %v164_v59  ;;  %v170_v7 = vmax.f32 %v87_v4, 0.0 }
  0x2f   :  { %248 = vst [vmem:[#allocation5 + $0x1e8] sm:$0xff] %v165_v60  ;;  %249 = vst [vmem:[#allocation5 + $0x1f0] sm:$0xff] %v166_v61  ;;  %v171_v8 = vmax.f32 %v88_v5, 0.0  ;;  %v172_v9 = vmax.f32 %v89_v6, 0.0  ;;  %v90_v10 = vld [vmem:[#allocation2 + $0x228] sm:$0xff]  ;;  %v91_v11 = vld [vmem:[#allocation2 + $0x230] sm:$0xff] }
  0x30   :  { %v92_v12 = vld [vmem:[#allocation2 + $0x238] sm:$0xff]  ;;  %250 = vst [vmem:[#allocation5 + $0x1f8] sm:$0xff] %v167_v1  ;;  %251 = vst [vmem:[#allocation5 + $0x200] sm:$0xff] %v168_v2  ;;  %v173_v13 = vmax.f32 %v90_v10, 0.0  ;;  %v174_v14 = vmax.f32 %v91_v11, 0.0  ;;  %v93_v16 = vld [vmem:[#allocation2 + $0x240] sm:$0xff] }
  0x31   :  { %252 = vst [vmem:[#allocation5 + $0x208] sm:$0xff] %v169_v3  ;;  %v175_v15 = vmax.f32 %v92_v12, 0.0  ;;  %v94_v17 = vld [vmem:[#allocation2 + $0x248] sm:$0xff]  ;;  %v95_v18 = vld [vmem:[#allocation2 + $0x250] sm:$0xff]  ;;  %253 = vst [vmem:[#allocation5 + $0x210] sm:$0xff] %v170_v7  ;;  %v176_v19 = vmax.f32 %v93_v16, 0.0 }
  0x32   :  { %254 = vst [vmem:[#allocation5 + $0x218] sm:$0xff] %v171_v8  ;;  %255 = vst [vmem:[#allocation5 + $0x220] sm:$0xff] %v172_v9  ;;  %v177_v20 = vmax.f32 %v94_v17, 0.0  ;;  %v178_v21 = vmax.f32 %v95_v18, 0.0  ;;  %v96_v22 = vld [vmem:[#allocation2 + $0x258] sm:$0xff]  ;;  %v97_v23 = vld [vmem:[#allocation2 + $0x260] sm:$0xff] }
  0x33   :  { %v98_v24 = vld [vmem:[#allocation2 + $0x268] sm:$0xff]  ;;  %256 = vst [vmem:[#allocation5 + $0x228] sm:$0xff] %v173_v13  ;;  %257 = vst [vmem:[#allocation5 + $0x230] sm:$0xff] %v174_v14  ;;  %v179_v25 = vmax.f32 %v96_v22, 0.0  ;;  %v180_v26 = vmax.f32 %v97_v23, 0.0  ;;  %v99_v28 = vld [vmem:[#allocation2 + $0x270] sm:$0xff] }
  0x34   :  { %258 = vst [vmem:[#allocation5 + $0x238] sm:$0xff] %v175_v15  ;;  %v181_v27 = vmax.f32 %v98_v24, 0.0  ;;  %v100_v29 = vld [vmem:[#allocation2 + $0x278] sm:$0xff]  ;;  %v101_v30 = vld [vmem:[#allocation2 + $0x280] sm:$0xff]  ;;  %259 = vst [vmem:[#allocation5 + $0x240] sm:$0xff] %v176_v19  ;;  %v182_v31 = vmax.f32 %v99_v28, 0.0 }
  0x35   :  { %260 = vst [vmem:[#allocation5 + $0x248] sm:$0xff] %v177_v20  ;;  %261 = vst [vmem:[#allocation5 + $0x250] sm:$0xff] %v178_v21  ;;  %v183_v32 = vmax.f32 %v100_v29, 0.0  ;;  %v184_v33 = vmax.f32 %v101_v30, 0.0  ;;  %v102_v34 = vld [vmem:[#allocation2 + $0x288] sm:$0xff]  ;;  %v103_v35 = vld [vmem:[#allocation2 + $0x290] sm:$0xff] }
  0x36   :  { %262 = vst [vmem:[#allocation5 + $0x258] sm:$0xff] %v179_v25  ;;  %263 = vst [vmem:[#allocation5 + $0x260] sm:$0xff] %v180_v26  ;;  %v185_v36 = vmax.f32 %v102_v34, 0.0  ;;  %v186_v37 = vmax.f32 %v103_v35, 0.0 }
  0x37   :  { %264 = vst [vmem:[#allocation5 + $0x268] sm:$0xff] %v181_v27  ;;  %265 = vst [vmem:[#allocation5 + $0x270] sm:$0xff] %v182_v31 }
  0x38   :  { %266 = vst [vmem:[#allocation5 + $0x278] sm:$0xff] %v183_v32  ;;  %267 = vst [vmem:[#allocation5 + $0x280] sm:$0xff] %v184_v33 }
  0x39   :  { %268 = vst [vmem:[#allocation5 + $0x288] sm:$0xff] %v185_v36  ;;  %270 = vst.msk [vmem:[#allocation5 + $0x290] sm:$0xff] %vm269_vm0, %v186_v37 }
  0x3a   :  { %319 = shalt.err (!%p316_p9)
}
  0x3b   :  { %280 = dma.vmem_to_hbm [thread:$0]  %s278_s12, 10624, %s354_s1, [#allocation4]  }
  0x3c   :  { %330 = dma.done.wait [#allocation4], 10624  }
  0x3d   :  { %331 = vsyncadd [#allocation4], 4294956672 }
  0x3e   :  { %284 = vsyncpa [#allocation3], 1 }
  0x3f   :  { %285 = vsyncpa [#allocation4], 1 }

</bundles_post_ra>
